<compile_context>
chip_gen: v7x
topology: tpu7x:2x2x1
jax: 0.10.0
libtpu: 0.0.40
codegen_flags: <defaults>
</compile_context>

<pallas_src>
import jax
import jax.numpy as jnp
from jax import lax
from jax.experimental import pallas as pl
from jax.experimental.pallas import tpu as pltpu


def text_cls_kernel(text_ref,      # VMEM [tT, 1]  int32   token ids for this tile
                    ctbl_ref,      # VMEM [V, C]   f32     full counts table
                    starts_ref,    # VMEM [B, 1]   int32   bag starts (offsets[:-1])
                    ends_ref,      # VMEM [B, 1]   int32   bag ends   (offsets[1:])
                    wb_ref,        # VMEM [C, dof] bf16    backbone weights
                    wfc_ref,       # VMEM [dof, NP] bf16   fc weight (transposed, lane-padded)
                    out_ref,       # VMEM [B, NP]  f32     lane-dense output
                    acc_ref):      # VMEM scratch [B, dof] f32  pooled accumulator
    tT = text_ref.shape[0]
    V = ctbl_ref.shape[0]
    B = starts_ref.shape[0]

    @pl.when(pl.program_id(0) == 0)
    def _():
        acc_ref[...] = jnp.zeros_like(acc_ref)

    # --- in-kernel vocab gather: one-hot(ids) @ counts_table  (exact, f32) ---
    ids = text_ref[...]                                              # [tT, 1]
    vocab_iota = lax.broadcasted_iota(jnp.int32, (tT, V), 1)
    onehot = (ids == vocab_iota).astype(jnp.float32)                 # [tT, V]
    counts = jnp.dot(onehot, ctbl_ref[...],
                     preferred_element_type=jnp.float32)             # [tT, C]

    # --- change_var normalization: counts / (relu(rowsum - 1) + 1) ---
    s = jnp.sum(counts, axis=1, keepdims=True)
    inv = pl.reciprocal(jnp.maximum(s - 1.0, 0.0) + 1.0, approx=True)
    data = (counts * inv).astype(jnp.bfloat16)                       # [tT, C] bf16

    # --- backbone: [tT, C] @ [C, dof] -> [tT, dof]  (MXU, bf16 in / f32 acc) ---
    emb = jnp.dot(data, wb_ref[...], preferred_element_type=jnp.float32)

    # --- segment-pooling matrix P[b, t] = (start_b <= t < end_b) / (relu(len_b - 1) + 1) ---
    tok0 = pl.program_id(0) * tT
    tok = tok0 + lax.broadcasted_iota(jnp.int32, (B, tT), 1)         # global token index
    starts = starts_ref[...]                                         # [B, 1]
    ends = ends_ref[...]                                             # [B, 1]
    in_bag = jnp.logical_and(tok >= starts, tok < ends)              # padded tokens -> all False
    lens = (ends - starts).astype(jnp.float32)
    invd = pl.reciprocal(jnp.maximum(lens - 1.0, 0.0) + 1.0, approx=True)
    p_mat = jnp.where(in_bag, invd, 0.0).astype(jnp.bfloat16)        # [B, tT]

    # --- accumulate pooled means across token tiles: [B, tT] @ [tT, dof] ---
    acc_ref[...] += jnp.dot(p_mat, emb.astype(jnp.bfloat16),
                            preferred_element_type=jnp.float32)

    # --- finalize: fc  [B, dof] @ [dof, NP] -> lane-dense [B, NP] ---
    @pl.when(pl.program_id(0) == pl.num_programs(0) - 1)
    def _():
        out_ref[...] = jnp.dot(acc_ref[...].astype(jnp.bfloat16), wfc_ref[...],
                               preferred_element_type=jnp.float32)


def text_classification_forward(text, offsets, counts_table, w_backbone, w_fc,
                                *, token_tile=128):
    """text: [T] int token ids; offsets: [B+1] bag boundaries (offsets[0]=0, offsets[-1]=T);
    counts_table: [V, C]; w_backbone: [C, dof]; w_fc: [num_class, dof] (nn.Linear weight)."""
    T = text.shape[0]
    B = offsets.shape[0] - 1
    V, C = counts_table.shape
    dof = w_backbone.shape[1]
    num_class = w_fc.shape[0]

    # Lane-dense output width (multiple of 128); sliced back below.
    NP = ((num_class + 127) // 128) * 128

    # Pad the token axis to a multiple of the tile; padded tokens fall outside every
    # [start, end) range so the pooling matrix zeroes their contribution.
    T_pad = ((T + token_tile - 1) // token_tile) * token_tile
    text_p = jnp.zeros((T_pad,), jnp.int32).at[:T].set(text.astype(jnp.int32))
    text_2d = text_p.reshape(T_pad, 1)

    starts = offsets[:-1].astype(jnp.int32).reshape(B, 1)
    ends = offsets[1:].astype(jnp.int32).reshape(B, 1)

    ctbl_f32 = counts_table.astype(jnp.float32)
    wb_bf16 = w_backbone.astype(jnp.bfloat16)
    wfc_pad = jnp.zeros((dof, NP), jnp.float32).at[:, :num_class].set(
        w_fc.T.astype(jnp.float32))
    wfc_bf16 = wfc_pad.astype(jnp.bfloat16)

    grid_spec = pltpu.PrefetchScalarGridSpec(
        num_scalar_prefetch=0,
        grid=(T_pad // token_tile,),
        in_specs=[
            pl.BlockSpec((token_tile, 1), lambda i: (i, 0)),   # token ids (tiled)
            pl.BlockSpec((V, C), lambda i: (0, 0)),            # counts table (resident)
            pl.BlockSpec((B, 1), lambda i: (0, 0)),            # bag starts
            pl.BlockSpec((B, 1), lambda i: (0, 0)),            # bag ends
            pl.BlockSpec((C, dof), lambda i: (0, 0)),          # backbone weight
            pl.BlockSpec((dof, NP), lambda i: (0, 0)),         # fc weight (padded)
        ],
        out_specs=pl.BlockSpec((B, NP), lambda i: (0, 0)),
        scratch_shapes=[pltpu.VMEM((B, dof), jnp.float32)],
    )
    out_padded = pl.pallas_call(
        text_cls_kernel,
        out_shape=jax.ShapeDtypeStruct((B, NP), jnp.float32),
        grid_spec=grid_spec,
        compiler_params=pltpu.CompilerParams(
            dimension_semantics=("arbitrary",),          # token axis is a reduction
            vmem_limit_bytes=32 * 1024 * 1024),
    )(text_2d, ctbl_f32, starts, ends, wb_bf16, wfc_bf16)
    return out_padded[:, :num_class]


def reference_forward(text, offsets, counts_table, w_backbone, w_fc):
    """Pure-JAX f32 mirror of the PyTorch forward (cumsum form of post_proc)."""
    c = counts_table[text].astype(jnp.float32)
    s = jnp.sum(c, axis=1, keepdims=True)
    data = c / (jnp.maximum(s - 1.0, 0.0) + 1.0)
    emb = data @ w_backbone
    cums = jnp.cumsum(emb, axis=0)
    top = cums[offsets[1] - 1][None, :]
    rest = cums[offsets[2:] - 1] - cums[offsets[1:-1] - 1]
    x = jnp.concatenate([top, rest], axis=0)
    denom = (jnp.maximum(offsets[1:] - offsets[:-1] - 1, 0) + 1).astype(jnp.float32)
    x = x / denom[:, None]
    return x @ w_fc.T


if __name__ == "__main__":
    key = jax.random.PRNGKey(0)
    k1, k2, k3, k4 = jax.random.split(key, 4)

    vocab_size = 50
    num_class = 4
    dof = 64
    T = 256          # total tokens in the batch (2 token tiles of 128)
    B = 8            # number of bags (documents)

    # Deterministic synthetic parameters (AG_NEWS-derived count table / vocab cannot be
    # rebuilt without the dataset; synthesize them).
    counts_table = jax.random.randint(k1, (vocab_size, num_class), 0, 10, dtype=jnp.int32)
    w_backbone = jax.random.normal(k2, (num_class, dof), dtype=jnp.float32) * 0.5
    # nn.Linear(dof, num_class, bias=False).weight has shape [num_class, dof].
    w_fc = jax.random.normal(k3, (num_class, dof), dtype=jnp.float32) * 0.3

    text = jax.random.randint(k4, (T,), 0, vocab_size, dtype=jnp.int32)
    offsets = jnp.arange(0, T + 1, T // B, dtype=jnp.int32)    # [B+1]: 0,32,...,256

    out = text_classification_forward(text, offsets, counts_table, w_backbone, w_fc)
    out = jax.block_until_ready(out)

    ref = reference_forward(text, offsets, counts_table, w_backbone, w_fc)
    assert out.shape == (B, num_class), out.shape
    # bf16 MXU operands + approx reciprocals -> compare against the f32 reference loosely.
    assert jnp.allclose(out, ref, rtol=3e-2, atol=3e-2), (out, ref)

    print("KERNEL_OK")
</pallas_src>

<mosaic_0001>
module attributes {stable_mosaic.version = 11 : i64} {
  func.func @text_cls_kernel(%arg0: i32, %arg1: memref<128x1xi32, #tpu.memory_space<vmem>>, %arg2: memref<50x4xf32, #tpu.memory_space<vmem>>, %arg3: memref<8x1xi32, #tpu.memory_space<vmem>>, %arg4: memref<8x1xi32, #tpu.memory_space<vmem>>, %arg5: memref<4x64xbf16, #tpu.memory_space<vmem>>, %arg6: memref<64x128xbf16, #tpu.memory_space<vmem>>, %arg7: memref<8x128xf32, #tpu.memory_space<vmem>>, %arg8: memref<8x64xf32, #tpu.memory_space<vmem>>) attributes {dimension_semantics = [#tpu.dimension_semantics<arbitrary>], iteration_bounds = array<i64: 2>, scalar_prefetch = 0 : i64, scratch_operands = 1 : i64, tpu.core_type = #tpu.core_type<tc>, window_params = [{transform_indices = @transform_0, window_bounds = array<i64: 128, 1>}, {pipeline_mode = #tpu.pipeline_mode<synchronous>, transform_indices = @transform_1, window_bounds = array<i64: 50, 4>}, {pipeline_mode = #tpu.pipeline_mode<synchronous>, transform_indices = @transform_2, window_bounds = array<i64: 8, 1>}, {pipeline_mode = #tpu.pipeline_mode<synchronous>, transform_indices = @transform_3, window_bounds = array<i64: 8, 1>}, {pipeline_mode = #tpu.pipeline_mode<synchronous>, transform_indices = @transform_4, window_bounds = array<i64: 4, 64>}, {pipeline_mode = #tpu.pipeline_mode<synchronous>, transform_indices = @transform_5, window_bounds = array<i64: 64, 128>}, {pipeline_mode = #tpu.pipeline_mode<synchronous>, transform_indices = @transform_6, window_bounds = array<i64: 8, 128>}]} {
    %c0_i32 = arith.constant 0 : i32
    %0 = arith.cmpi eq, %arg0, %c0_i32 : i32
    %1 = arith.extui %0 : i1 to i32
    %c0_i32_0 = arith.constant 0 : i32
    %2 = arith.cmpi ne, %1, %c0_i32_0 : i32
    scf.if %2 {
      %cst_25 = arith.constant 0.000000e+00 : f32
      %58 = vector.broadcast %cst_25 : f32 to vector<8x64xf32>
      %c0_26 = arith.constant 0 : index
      %c0_27 = arith.constant 0 : index
      %59 = vector.load %arg8[%c0_26, %c0_27] : memref<8x64xf32, #tpu.memory_space<vmem>>, vector<8x64xf32>
      tpu.vector_store %arg8[%c0_26, %c0_27], %58 {strides = array<i32>} : memref<8x64xf32, #tpu.memory_space<vmem>>, vector<8x64xf32>,
    } else {
    }
    %c0 = arith.constant 0 : index
    %c0_1 = arith.constant 0 : index
    %3 = vector.load %arg1[%c0, %c0_1] : memref<128x1xi32, #tpu.memory_space<vmem>>, vector<128x1xi32>
    %4 = tpu.iota {dimensions = array<i32: 1>} : vector<128x50xi32>
    %5 = vector.broadcast %3 : vector<128x1xi32> to vector<128x50xi32>
    %6 = arith.cmpi eq, %5, %4 : vector<128x50xi32>
    %7 = arith.extui %6 : vector<128x50xi1> to vector<128x50xi32>
    %8 = arith.sitofp %7 : vector<128x50xi32> to vector<128x50xf32>
    %c0_2 = arith.constant 0 : index
    %c0_3 = arith.constant 0 : index
    %9 = vector.load %arg2[%c0_2, %c0_3] : memref<50x4xf32, #tpu.memory_space<vmem>>, vector<50x4xf32>
    %cst = arith.constant dense<0.000000e+00> : vector<128x4xf32>
    %10 = tpu.matmul %8, %9, %cst {dimension_numbers = #tpu.dot_dimension_numbers<[1], [0], [0], [1], [0, 0, 1, 1], [], []>} : vector<128x50xf32>, vector<50x4xf32>, vector<128x4xf32> -> vector<128x4xf32>
    %cst_4 = arith.constant dense<0.000000e+00> : vector<128xf32>
    %11 = vector.multi_reduction <add>, %10, %cst_4 [1] : vector<128x4xf32> to vector<128xf32>
    %12 = vector.shape_cast %11 : vector<128xf32> to vector<128x1xf32>
    %cst_5 = arith.constant 1.000000e+00 : f32
    %13 = vector.broadcast %cst_5 : f32 to vector<128x1xf32>
    %14 = arith.subf %12, %13 : vector<128x1xf32>
    %cst_6 = arith.constant 0.000000e+00 : f32
    %15 = vector.broadcast %cst_6 : f32 to vector<128x1xf32>
    %16 = arith.maximumf %14, %15 : vector<128x1xf32>
    %cst_7 = arith.constant 1.000000e+00 : f32
    %17 = vector.broadcast %cst_7 : f32 to vector<128x1xf32>
    %18 = arith.addf %16, %17 : vector<128x1xf32>
    %19 = tpu.reciprocal %18 {approx = true} : vector<128x1xf32> -> vector<128x1xf32>
    %20 = vector.broadcast %19 : vector<128x1xf32> to vector<128x4xf32>
    %21 = arith.mulf %10, %20 : vector<128x4xf32>
    %22 = arith.truncf %21 : vector<128x4xf32> to vector<128x4xbf16>
    %c0_8 = arith.constant 0 : index
    %c0_9 = arith.constant 0 : index
    %23 = vector.load %arg5[%c0_8, %c0_9] : memref<4x64xbf16, #tpu.memory_space<vmem>>, vector<4x64xbf16>
    %cst_10 = arith.constant dense<0.000000e+00> : vector<128x64xf32>
    %24 = tpu.matmul %22, %23, %cst_10 {dimension_numbers = #tpu.dot_dimension_numbers<[1], [0], [0], [1], [0, 0, 1, 1], [], []>} : vector<128x4xbf16>, vector<4x64xbf16>, vector<128x64xf32> -> vector<128x64xf32>
    %c128_i32 = arith.constant 128 : i32
    %25 = arith.muli %arg0, %c128_i32 : i32
    %26 = tpu.iota {dimensions = array<i32: 1>} : vector<8x128xi32>
    %27 = vector.broadcast %25 : i32 to vector<8x128xi32>
    %28 = arith.addi %27, %26 : vector<8x128xi32>
    %c0_11 = arith.constant 0 : index
    %c0_12 = arith.constant 0 : index
    %29 = vector.load %arg3[%c0_11, %c0_12] : memref<8x1xi32, #tpu.memory_space<vmem>>, vector<8x1xi32>
    %c0_13 = arith.constant 0 : index
    %c0_14 = arith.constant 0 : index
    %30 = vector.load %arg4[%c0_13, %c0_14] : memref<8x1xi32, #tpu.memory_space<vmem>>, vector<8x1xi32>
    %31 = vector.broadcast %29 : vector<8x1xi32> to vector<8x128xi32>
    %32 = arith.cmpi sge, %28, %31 : vector<8x128xi32>
    %33 = vector.broadcast %30 : vector<8x1xi32> to vector<8x128xi32>
    %34 = arith.cmpi slt, %28, %33 : vector<8x128xi32>
    %35 = arith.andi %32, %34 : vector<8x128xi1>
    %36 = arith.subi %30, %29 : vector<8x1xi32>
    %37 = arith.sitofp %36 : vector<8x1xi32> to vector<8x1xf32>
    %cst_15 = arith.constant 1.000000e+00 : f32
    %38 = vector.broadcast %cst_15 : f32 to vector<8x1xf32>
    %39 = arith.subf %37, %38 : vector<8x1xf32>
    %cst_16 = arith.constant 0.000000e+00 : f32
    %40 = vector.broadcast %cst_16 : f32 to vector<8x1xf32>
    %41 = arith.maximumf %39, %40 : vector<8x1xf32>
    %cst_17 = arith.constant 1.000000e+00 : f32
    %42 = vector.broadcast %cst_17 : f32 to vector<8x1xf32>
    %43 = arith.addf %41, %42 : vector<8x1xf32>
    %44 = tpu.reciprocal %43 {approx = true} : vector<8x1xf32> -> vector<8x1xf32>
    %cst_18 = arith.constant 0.000000e+00 : f32
    %45 = vector.shape_cast %44 : vector<8x1xf32> to vector<8x1xf32>
    %46 = vector.broadcast %45 : vector<8x1xf32> to vector<8x128xf32>
    %47 = vector.broadcast %cst_18 : f32 to vector<8x128xf32>
    %48 = arith.select %35, %46, %47 : vector<8x128xi1>, vector<8x128xf32>
    %49 = arith.truncf %48 : vector<8x128xf32> to vector<8x128xbf16>
    %c0_19 = arith.constant 0 : index
    %c0_20 = arith.constant 0 : index
    %50 = vector.load %arg8[%c0_19, %c0_20] : memref<8x64xf32, #tpu.memory_space<vmem>>, vector<8x64xf32>
    %51 = arith.truncf %24 : vector<128x64xf32> to vector<128x64xbf16>
    %cst_21 = arith.constant dense<0.000000e+00> : vector<8x64xf32>
    %52 = tpu.matmul %49, %51, %cst_21 {dimension_numbers = #tpu.dot_dimension_numbers<[1], [0], [0], [1], [0, 0, 1, 1], [], []>} : vector<8x128xbf16>, vector<128x64xbf16>, vector<8x64xf32> -> vector<8x64xf32>
    %53 = arith.addf %50, %52 : vector<8x64xf32>
    %c0_22 = arith.constant 0 : index
    %c0_23 = arith.constant 0 : index
    %54 = vector.load %arg8[%c0_22, %c0_23] : memref<8x64xf32, #tpu.memory_space<vmem>>, vector<8x64xf32>
    tpu.vector_store %arg8[%c0_22, %c0_23], %53 {strides = array<i32>} : memref<8x64xf32, #tpu.memory_space<vmem>>, vector<8x64xf32>,
    %c1_i32 = arith.constant 1 : i32
    %55 = arith.cmpi eq, %arg0, %c1_i32 : i32
    %56 = arith.extui %55 : i1 to i32
    %c0_i32_24 = arith.constant 0 : i32
    %57 = arith.cmpi ne, %56, %c0_i32_24 : i32
    scf.if %57 {
      %c0_25 = arith.constant 0 : index
      %c0_26 = arith.constant 0 : index
      %58 = vector.load %arg8[%c0_25, %c0_26] : memref<8x64xf32, #tpu.memory_space<vmem>>, vector<8x64xf32>
      %59 = arith.truncf %58 : vector<8x64xf32> to vector<8x64xbf16>
      %c0_27 = arith.constant 0 : index
      %c0_28 = arith.constant 0 : index
      %60 = vector.load %arg6[%c0_27, %c0_28] : memref<64x128xbf16, #tpu.memory_space<vmem>>, vector<64x128xbf16>
      %cst_29 = arith.constant dense<0.000000e+00> : vector<8x128xf32>
      %61 = tpu.matmul %59, %60, %cst_29 {dimension_numbers = #tpu.dot_dimension_numbers<[1], [0], [0], [1], [0, 0, 1, 1], [], []>} : vector<8x64xbf16>, vector<64x128xbf16>, vector<8x128xf32> -> vector<8x128xf32>
      %c0_30 = arith.constant 0 : index
      %c0_31 = arith.constant 0 : index
      %62 = vector.load %arg7[%c0_30, %c0_31] : memref<8x128xf32, #tpu.memory_space<vmem>>, vector<8x128xf32>
      tpu.vector_store %arg7[%c0_30, %c0_31], %61 {strides = array<i32>} : memref<8x128xf32, #tpu.memory_space<vmem>>, vector<8x128xf32>,
    } else {
    }
    return
  }
  func.func @transform_0(%arg0: i32) -> (i32, i32) {
    %c0_i32 = arith.constant 0 : i32
    %c0_i32_0 = arith.constant 0 : i32
    return %arg0, %c0_i32 : i32, i32
  }
  func.func @transform_1(%arg0: i32) -> (i32, i32) {
    %c0_i32 = arith.constant 0 : i32
    %c0_i32_0 = arith.constant 0 : i32
    %c0_i32_1 = arith.constant 0 : i32
    return %c0_i32, %c0_i32_0 : i32, i32
  }
  func.func @transform_2(%arg0: i32) -> (i32, i32) {
    %c0_i32 = arith.constant 0 : i32
    %c0_i32_0 = arith.constant 0 : i32
    %c0_i32_1 = arith.constant 0 : i32
    return %c0_i32, %c0_i32_0 : i32, i32
  }
  func.func @transform_3(%arg0: i32) -> (i32, i32) {
    %c0_i32 = arith.constant 0 : i32
    %c0_i32_0 = arith.constant 0 : i32
    %c0_i32_1 = arith.constant 0 : i32
    return %c0_i32, %c0_i32_0 : i32, i32
  }
  func.func @transform_4(%arg0: i32) -> (i32, i32) {
    %c0_i32 = arith.constant 0 : i32
    %c0_i32_0 = arith.constant 0 : i32
    %c0_i32_1 = arith.constant 0 : i32
    return %c0_i32, %c0_i32_0 : i32, i32
  }
  func.func @transform_5(%arg0: i32) -> (i32, i32) {
    %c0_i32 = arith.constant 0 : i32
    %c0_i32_0 = arith.constant 0 : i32
    %c0_i32_1 = arith.constant 0 : i32
    return %c0_i32, %c0_i32_0 : i32, i32
  }
  func.func @transform_6(%arg0: i32) -> (i32, i32) {
    %c0_i32 = arith.constant 0 : i32
    %c0_i32_0 = arith.constant 0 : i32
    %c0_i32_1 = arith.constant 0 : i32
    return %c0_i32, %c0_i32_0 : i32, i32
  }
}

</mosaic_0001>

<bundles_post_ra>
// kernel: tpu_custom_call.1
= control target key start
LH: loop header
LB: loop body
LE: loop exit
PB: predicated region body
PF: predicated region fallthrough
CT: control target
= control target key end

     0   :  { %11 = vsyncpa [#allocation4], 0  ;;  %s1402_s21 = smov 0   ;;  %s1659_s0 = inlined_call_operand.vmem [shape: s32[256,1], index: 0, kind: input, shape index: {}]   ;;  %s1660_s1 = inlined_call_operand.vmem [shape: f32[50,4], index: 1, kind: input, shape index: {}]   ;;  %s1661_s2 = inlined_call_operand.vmem [shape: s32[8,1], index: 2, kind: input, shape index: {}]   ;;  %s1662_s3 = inlined_call_operand.vmem [shape: s32[8,1], index: 3, kind: input, shape index: {}]   ;;  %s1663_s4 = inlined_call_operand.vmem [shape: bf16[4,64], index: 4, kind: input, shape index: {}]   ;;  %s1664_s5 = inlined_call_operand.vmem [shape: bf16[64,128], index: 5, kind: input, shape index: {}]   ;;  %s1665_s6 = inlined_call_operand.hbm [shape: f32[8,128], index: 6, kind: output, shape index: {}]  }
   0x1 LB: > { %s1408_s22 = sadd.s32 4294967295, %s1358_s21   ;;  %p1038_p0 = scmp.ge.s32.totalorder %s1358_s21, 1  ;;  %s1358_s21 = sphi %s1402_s21, %s17_s21  }
   0x2   : > { %p209_p1 = scmp.lt.s32.totalorder %s1358_s21, 3 }
   0x4   : > { %p210_p2 = pnand %p1038_p0, %p209_p1 }
   0x5   : > { %s1039_s23 = sshll.u32 (!%p210_p2), %s1408_s22, 4  ;;  %p1041_p4 = scmp.ne.s32.totalorder (!%p210_p2), %s1408_s22, 0 }
   0x6   : > { %213 = sbr.rel (%p210_p2) target bundleno = 1254 (0x4e6), region = 44  ;;  %p235_p3 = scmp.lt.s32.totalorder (!%p210_p2), %s1039_s23, 31 }
   0xd   : > { %s1667_s23 = smov (!%p235_p3, %s1039_s23), 31  ;;  %244 = sbr.rel (%p1041_p4) target bundleno = 20 (0x14), region = 48 }
   0xe   : > { %s1040_s24 = sshll.u32 %s1667_s23, 3  ;;  %vm245_vm0 = vcmask (!%p1041_p4), 523264   ;;  %v1360_v0 = vmov (!%p1041_p4), 0.0  }
   0xf   : > { %s1416_s27 = scalar_lea.vmem %s1659_s0, %s1040_s24  ;;  %246 = vst.msk [vmem:[#allocation2] sm:$0xff] (!%p1041_p4), %vm245_vm0, %v1360_v0 }
  0x14 PF: > { %v249_v1 = vld [vmem:[%s1416_s27 + $0x10] sm:$0xff]  ;;  %v247_v2 = vld [vmem:[%s1416_s27] sm:$0xff]  ;;  %v1361_v3 = vmov 0   ;;  %v250_v4 = vld [vmem:[%s1416_s27 + $0x18] sm:$0xff]  ;;  %vm417_vm1 = vcmask 1041408   ;;  %v263_v28 = vlaneseq  ;;  %vm368_vm2 = vcmask 408576  }
  0x15   : > { %1283 = vset.pattern.permute.xlu1 %v1361_v3  ;;  %1282 = vset.pattern.permute.xlu0 %v1361_v3  ;;  %v248_v5 = vld [vmem:[%s1416_s27 + $0x8] sm:$0xff]  ;;  %v361_v6 = vld [vmem:[%s1660_s1] sm:$0xff]  ;;  %v363_v9 = vld [vmem:[%s1660_s1 + $0x10] sm:$0xff]  ;;  %v1362_v32 = vmov 0.0   ;;  %s1099_s26 = sshll.u32 %s1408_s22, 7  ;;  %p1104_p5 = scmp.ne.s32.totalorder %s1408_s22, 1 }
  0x16   : > { %272 = vperm.xlu1 %1283, %v249_v1   ;;  %266 = vperm.xlu0 %1282, %v247_v2   ;;  %v362_v7 = vld [vmem:[%s1660_s1 + $0x8] sm:$0xff]  ;;  %v364_v10 = vld [vmem:[%s1660_s1 + $0x18] sm:$0xff]  ;;  %v251_v12 = vld [vmem:[%s1416_s27 + $0x20] sm:$0xff]  ;;  %v1458_v29 = vand.u32 127, %v263_v28 }
  0x17   : > { %v1248_v8 = vpack.c.bf16 %v362_v7, %v361_v6  ;;  %v252_v11 = vld [vmem:[%s1416_s27 + $0x28] sm:$0xff]  ;;  %v1252_v13 = vpack.c.bf16 %v364_v10, %v363_v9  ;;  %v365_v14 = vld [vmem:[%s1660_s1 + $0x20] sm:$0xff]  ;;  %v254_v16 = vld [vmem:[%s1416_s27 + $0x38] sm:$0xff] }
  0x18   : > { %v366_v15 = vld [vmem:[%s1660_s1 + $0x28] sm:$0xff]  ;;  %v253_v17 = vld [vmem:[%s1416_s27 + $0x30] sm:$0xff]  ;;  %v255_v20 = vld [vmem:[%s1416_s27 + $0x40] sm:$0xff] }
  0x19   : > { %1249 = vmatprep.subr.bf16.mxu0 %v1248_v8  ;;  %v1256_v18 = vpack.c.bf16 %v366_v15, %v365_v14  ;;  %v256_v19 = vld [vmem:[%s1416_s27 + $0x48] sm:$0xff]  ;;  %v367_v21 = vld [vmem:[%s1660_s1 + $0x30] sm:$0x3]  ;;  %v258_v22 = vld [vmem:[%s1416_s27 + $0x58] sm:$0xff] }
  0x1a   : > { %275 = vperm.xlu1 %1283, %v250_v4   ;;  %269 = vperm.xlu0 %1282, %v248_v5   ;;  %v257_v23 = vld [vmem:[%s1416_s27 + $0x50] sm:$0xff]  ;;  %v260_v24 = vld [vmem:[%s1416_s27 + $0x68] sm:$0xff]  ;;  %v259_v25 = vld [vmem:[%s1416_s27 + $0x60] sm:$0xff] }
  0x1b   : > { %1251 = vmatpush3.bf16.msra.mxu0 %v1248_v8  ;;  %v262_v26 = vld [vmem:[%s1416_s27 + $0x78] sm:$0xff]  ;;  %v261_v27 = vld [vmem:[%s1416_s27 + $0x70] sm:$0xff]  ;;  %v831_v15 = vld [vmem:[%s1661_s2] sm:$0xff] }
  0x1c   : > { %1253 = vmatprep.subr.bf16.mxu0 %v1252_v13 }
  0x1e   : > { %281 = vperm.xlu1 %1283, %v252_v11   ;;  %278 = vperm.xlu0 %1282, %v251_v12  }
  0x1f   : > { %1255 = vmatpush3.bf16.msra.mxu0 %v1252_v13 }
  0x20   : > { %1257 = vmatprep.subr.bf16.mxu0 %v1256_v18 }
  0x22   : > { %287 = vperm.xlu1 %1283, %v254_v16   ;;  %284 = vperm.xlu0 %1282, %v253_v17   ;;  %v832_v16 = vld [vmem:[%s1662_s3] sm:$0xff] }
  0x23   : > { %1259 = vmatpush3.bf16.msra.mxu0 %v1256_v18 }
  0x24   : > { %1172 = vmatprep.subr.msk.mxu0 %vm417_vm1, %v367_v21 }
  0x26   : > { %293 = vperm.xlu1 %1283, %v256_v19   ;;  %290 = vperm.xlu0 %1282, %v255_v20   ;;  %v842_v20 = vsub.s32 %v832_v16, %v831_v15 }
  0x27   : > { %1173 = vmatpush3.msk.msra.mxu0 %vm417_vm1, %v367_v21 }
  0x2a   : > { %299 = vperm.xlu1 %1283, %v258_v22   ;;  %296 = vperm.xlu0 %1282, %v257_v23  }
  0x2e   : > { %305 = vperm.xlu1 %1283, %v260_v24   ;;  %302 = vperm.xlu0 %1282, %v259_v25   ;;  %v843_v25 = vcvt.s32.f32 %v842_v20 }
  0x32   : > { %311 = vperm.xlu1 %1283, %v262_v26   ;;  %308 = vperm.xlu0 %1282, %v261_v27  }
  0x95   : > { %v273_v30 = vpop.permute.xlu1 %272  ;;  %v267_v31 = vpop.permute.xlu0 %266 }
  0x96   : > { %vm313_vm3 = vcmp.eq.s32.totalorder %v267_v31, %v1458_v29  ;;  %vm315_vm4 = vcmp.eq.s32.totalorder %v273_v30, %v1458_v29  ;;  %v1100_v31 = vadd.f32 -1.0, %v843_v25 }
  0x97   : > { %v1042_v33 = vsel %vm313_vm3, 1.0, %v1362_v32  ;;  %v1044_v36 = vsel %vm315_vm4, 1.0, %v1362_v32 }
  0x98   : > { %1174 = vmatprep.mubr.msk.f32.mxu0 %vm368_vm2, %v1042_v33 }
  0x99   : > { %v276_v34 = vpop.permute.xlu1 %275  ;;  %v270_v35 = vpop.permute.xlu0 %269 }
  0x9a   : > { %vm314_vm5 = vcmp.eq.s32.totalorder %v270_v35, %v1458_v29  ;;  %vm316_vm6 = vcmp.eq.s32.totalorder %v276_v34, %v1458_v29 }
  0x9b   : > { %v1043_v37 = vsel %vm314_vm5, 1.0, %v1362_v32  ;;  %v1045_v40 = vsel %vm316_vm6, 1.0, %v1362_v32  ;;  %vm566_vm5 = vcmask 31744  }
  0x9c   : > { %1175 = vmatmul.mubr.msk.f32.vlgmr.msra.gmra.mrb[0].mxu0 %vm368_vm2, %v1043_v37  ;;  %v845_v37 = vmax.f32 %v1100_v31, 0.0 }
  0x9d   : > { %v282_v38 = vpop.permute.xlu1 %281  ;;  %1177 = vmatprep.mubr.msk.f32.mxu0 %vm368_vm2, %v1044_v36  ;;  %v279_v39 = vpop.permute.xlu0 %278 }
  0x9e   : > { %vm317_vm7 = vcmp.eq.s32.totalorder %v279_v39, %v1458_v29  ;;  %vm318_vm8 = vcmp.eq.s32.totalorder %v282_v38, %v1458_v29  ;;  %v846_v39 = vadd.f32 1.0, %v845_v37 }
  0x9f   : > { %v1046_v41 = vsel %vm317_vm7, 1.0, %v1362_v32  ;;  %v1047_v44 = vsel %vm318_vm8, 1.0, %v1362_v32 }
  0xa0   : > { %1178 = vmatmul.mubr.msk.f32.gmra.mrb[2].mxu0 %vm368_vm2, %v1045_v40  ;;  %1284 = vrcp.f32 %v846_v39  ;;  %v703_v40 = vld [vmem:[%s1663_s4] sm:$0x3] }
  0xa1   : > { %v288_v42 = vpop.permute.xlu1 %287  ;;  %1180 = vmatprep.mubr.msk.f32.mxu0 %vm368_vm2, %v1046_v41  ;;  %v285_v43 = vpop.permute.xlu0 %284  ;;  %1260 = vmatprep.subr.msk.bf16.mxu1 %vm417_vm1, %v703_v40  ;;  %v729_v41 = vsel %vm417_vm1, %v703_v40, 0  ;;  %vm1363_vm1 = vmmov 0  }
  0xa2   : > { %vm319_vm9 = vcmp.eq.s32.totalorder %v285_v43, %v1458_v29  ;;  %vm320_vm10 = vcmp.eq.s32.totalorder %v288_v42, %v1458_v29  ;;  %1199 = vmatpush3.bf16.msra.mxu1 %v729_v41 }
  0xa3   : > { %v1048_v45 = vsel %vm319_vm9, 1.0, %v1362_v32  ;;  %v1049_v48 = vsel %vm320_vm10, 1.0, %v1362_v32  ;;  %1216 = vmatprep.subr.bf16.mxu1 %v1362_v32  ;;  %vm905_vm9 = vcmask 523264   ;;  %vm1365_vm10 = vmmov (!%p1104_p5), 0  }
  0xa4   : > { %1181 = vmatmul.mubr.msk.f32.gmra.mrb[4].mxu0 %vm368_vm2, %v1047_v44 }
  0xa5   : > { %v294_v46 = vpop.permute.xlu1 %293  ;;  %1183 = vmatprep.mubr.msk.f32.mxu0 %vm368_vm2, %v1048_v45  ;;  %v291_v47 = vpop.permute.xlu0 %290 }
  0xa6   : > { %vm321_vm11 = vcmp.eq.s32.totalorder %v291_v47, %v1458_v29  ;;  %vm322_vm12 = vcmp.eq.s32.totalorder %v294_v46, %v1458_v29 }
  0xa7   : > { %v1050_v49 = vsel %vm321_vm11, 1.0, %v1362_v32  ;;  %v1051_v52 = vsel %vm322_vm12, 1.0, %v1362_v32 }
  0xa8   : > { %1184 = vmatmul.mubr.msk.f32.gmra.mrb[6].mxu0 %vm368_vm2, %v1049_v48 }
  0xa9   : > { %v300_v50 = vpop.permute.xlu1 %299  ;;  %1186 = vmatprep.mubr.msk.f32.mxu0 %vm368_vm2, %v1050_v49  ;;  %v297_v51 = vpop.permute.xlu0 %296 }
  0xaa   : > { %vm323_vm13 = vcmp.eq.s32.totalorder %v297_v51, %v1458_v29  ;;  %vm324_vm14 = vcmp.eq.s32.totalorder %v300_v50, %v1458_v29  ;;  %v1285_v42 = vpop.eup %1284 }
  0xab   : > { %v1052_v53 = vsel %vm323_vm13, 1.0, %v1362_v32  ;;  %v1053_v56 = vsel %vm324_vm14, 1.0, %v1362_v32 }
  0xac   : > { %1187 = vmatmul.mubr.msk.f32.gmra.mrb[8].mxu0 %vm368_vm2, %v1051_v52 }
  0xad   : > { %v306_v54 = vpop.permute.xlu1 %305  ;;  %1189 = vmatprep.mubr.msk.f32.mxu0 %vm368_vm2, %v1052_v53  ;;  %v303_v55 = vpop.permute.xlu0 %302 }
  0xae   : > { %vm325_vm15 = vcmp.eq.s32.totalorder %v303_v55, %v1458_v29  ;;  %vm326_vm0 = vcmp.eq.s32.totalorder %v306_v54, %v1458_v29 }
  0xaf   : > { %v1054_v57 = vsel %vm325_vm15, 1.0, %v1362_v32  ;;  %v1055_v60 = vsel %vm326_vm0, 1.0, %v1362_v32 }
  0xb0   : > { %1190 = vmatmul.mubr.msk.f32.gmra.mrb[10].mxu0 %vm368_vm2, %v1053_v56 }
  0xb1   : > { %v312_v58 = vpop.permute.xlu1 %311  ;;  %1192 = vmatprep.mubr.msk.f32.mxu0 %vm368_vm2, %v1054_v57  ;;  %v309_v59 = vpop.permute.xlu0 %308 }
  0xb2   : > { %vm327_vm3 = vcmp.eq.s32.totalorder %v309_v59, %v1458_v29  ;;  %vm328_vm4 = vcmp.eq.s32.totalorder %v312_v58, %v1458_v29 }
  0xb3   : > { %v1056_v61 = vsel %vm327_vm3, 1.0, %v1362_v32  ;;  %v1057_v62 = vsel %vm328_vm4, 1.0, %v1362_v32 }
  0xb4   : > { %1193 = vmatmul.mubr.msk.f32.gmra.mrb[12].mxu0 %vm368_vm2, %v1055_v60 }
  0xb5   : > { %1195 = vmatprep.mubr.msk.f32.mxu0 %vm368_vm2, %v1056_v61 }
  0xb8   : > { %1196 = vmatmul.mubr.msk.f32.gmra.mrb[14].mxu0 %vm368_vm2, %v1057_v62 }
 0x16f   : > { %v1508_v63 = vpop.f32.mrb[0].mxu0 }
 0x170   : > { %v1510_v0 = vpop.f32.mrb[1].mxu0  ;;  %v570_v1 = vsel %vm566_vm5, %v1508_v63, 0.0 }
 0x171   : > { %571 = vadd.xlane.f32.xlu1 %v570_v1  ;;  %v567_v2 = vsel %vm566_vm5, %v1510_v0, 0.0 }
 0x172   : > { %568 = vadd.xlane.f32.xlu0 %v567_v2 }
 0x173   : > { %v1516_v3 = vpop.f32.mrb[2].mxu0 }
 0x174   : > { %v1518_v4 = vpop.f32.mrb[3].mxu0  ;;  %v576_v5 = vsel %vm566_vm5, %v1516_v3, 0.0 }
 0x175   : > { %v573_v8 = vsel %vm566_vm5, %v1518_v4, 0.0 }
 0x176   : > { %577 = vadd.xlane.f32.xlu0 %v576_v5 }
 0x177   : > { %v1522_v6 = vpop.f32.mrb[4].mxu0 }
 0x178   : > { %v1524_v7 = vpop.f32.mrb[5].mxu0  ;;  %v582_v12 = vsel %vm566_vm5, %v1522_v6, 0.0 }
 0x179   : > { %v579_v9 = vsel %vm566_vm5, %v1524_v7, 0.0 }
 0x17a   : > { %574 = vadd.xlane.f32.xlu0 %v573_v8  ;;  %580 = vadd.xlane.f32.xlu1 %v579_v9 }
 0x17b   : > { %v1530_v10 = vpop.f32.mrb[6].mxu0 }
 0x17c   : > { %v1532_v11 = vpop.f32.mrb[7].mxu0  ;;  %v588_v18 = vsel %vm566_vm5, %v1530_v10, 0.0 }
 0x17d   : > { %v585_v13 = vsel %vm566_vm5, %v1532_v11, 0.0 }
 0x17e   : > { %583 = vadd.xlane.f32.xlu0 %v582_v12  ;;  %586 = vadd.xlane.f32.xlu1 %v585_v13 }
 0x17f   : > { %v1538_v14 = vpop.f32.mrb[8].mxu0 }
 0x180   : > { %v1546_v17 = vpop.f32.mrb[9].mxu0  ;;  %v594_v23 = vsel %vm566_vm5, %v1538_v14, 0.0 }
 0x181   : > { %v591_v19 = vsel %vm566_vm5, %v1546_v17, 0.0 }
 0x182   : > { %589 = vadd.xlane.f32.xlu0 %v588_v18  ;;  %592 = vadd.xlane.f32.xlu1 %v591_v19 }
 0x183   : > { %v1552_v21 = vpop.f32.mrb[10].mxu0 }
 0x184   : > { %v1554_v22 = vpop.f32.mrb[11].mxu0  ;;  %v600_v28 = vsel %vm566_vm5, %v1552_v21, 0.0 }
 0x185   : > { %v597_v24 = vsel %vm566_vm5, %v1554_v22, 0.0 }
 0x186   : > { %595 = vadd.xlane.f32.xlu0 %v594_v23  ;;  %598 = vadd.xlane.f32.xlu1 %v597_v24 }
 0x187   : > { %v1560_v26 = vpop.f32.mrb[12].mxu0 }
 0x188   : > { %v1562_v27 = vpop.f32.mrb[13].mxu0  ;;  %v606_v35 = vsel %vm566_vm5, %v1560_v26, 0.0 }
 0x189   : > { %v603_v30 = vsel %vm566_vm5, %v1562_v27, 0.0 }
 0x18a   : > { %601 = vadd.xlane.f32.xlu0 %v600_v28  ;;  %604 = vadd.xlane.f32.xlu1 %v603_v30 }
 0x18b   : > { %v1568_v33 = vpop.f32.mrb[14].mxu0 }
 0x18c   : > { %v1570_v34 = vpop.f32.mrb[15].mxu0  ;;  %v612_v38 = vsel %vm566_vm5, %v1568_v33, 0.0 }
 0x18d   : > { %v609_v36 = vsel %vm566_vm5, %v1570_v34, 0.0 }
 0x18e   : > { %607 = vadd.xlane.f32.xlu0 %v606_v35  ;;  %610 = vadd.xlane.f32.xlu1 %v609_v36 }
 0x192   : > { %613 = vadd.xlane.f32.xlu0 %v612_v38 }
 0x19f   : > { %834 = vperm.xlu1 %1283, %v831_v15  }
 0x1a3   : > { %850 = vperm.xlu1 %1283, %v1285_v42  }
 0x1a8   : > { %838 = vperm.xlu0 %1282, %v832_v16  }
 0x1fe   : > { %v572_v43 = vpop.xlane.xlu1 %571 }
 0x1ff   : > { %v1076_v44 = vadd.f32 -1.0, %v572_v43  ;;  %v569_v45 = vpop.xlane.xlu0 %568 }
 0x200   : > { %v1075_v46 = vadd.f32 -1.0, %v569_v45 }
 0x201   : > { %v632_v47 = vmax.f32 %v1076_v44, 0.0 }
 0x202   : > { %v631_v48 = vmax.f32 %v1075_v46, 0.0 }
 0x203   : > { %v648_v49 = vadd.f32 1.0, %v632_v47  ;;  %v578_v50 = vpop.xlane.xlu0 %577 }
 0x204   : > { %v647_v51 = vadd.f32 1.0, %v631_v48  ;;  %v1078_v52 = vadd.f32 -1.0, %v578_v50 }
 0x205   : > { %1286 = vrcp.f32 %v648_v49 }
 0x206   : > { %1288 = vrcp.f32 %v647_v51  ;;  %v634_v53 = vmax.f32 %v1078_v52, 0.0 }
 0x207   : > { %v581_v54 = vpop.xlane.xlu1 %580  ;;  %v575_v55 = vpop.xlane.xlu0 %574 }
 0x208   : > { %v1079_v56 = vadd.f32 -1.0, %v581_v54  ;;  %v1077_v57 = vadd.f32 -1.0, %v575_v55  ;;  %v650_v58 = vadd.f32 1.0, %v634_v53 }
 0x20a   : > { %v635_v59 = vmax.f32 %v1079_v56, 0.0  ;;  %v633_v60 = vmax.f32 %v1077_v57, 0.0  ;;  %1290 = vrcp.f32 %v650_v58 }
 0x20b   : > { %v587_v61 = vpop.xlane.xlu1 %586  ;;  %v584_v62 = vpop.xlane.xlu0 %583 }
 0x20c   : > { %v649_v1 = vadd.f32 1.0, %v633_v60  ;;  %v1081_v2 = vadd.f32 -1.0, %v587_v61  ;;  %v1080_v5 = vadd.f32 -1.0, %v584_v62  ;;  %v651_v8 = vadd.f32 1.0, %v635_v59 }
 0x20e   : > { %v637_v9 = vmax.f32 %v1081_v2, 0.0  ;;  %v636_v12 = vmax.f32 %v1080_v5, 0.0  ;;  %1292 = vrcp.f32 %v649_v1 }
 0x20f   : > { %v1287_v13 = vpop.eup %1286  ;;  %v593_v15 = vpop.xlane.xlu1 %592  ;;  %1294 = vrcp.f32 %v651_v8 }
 0x210   : > { %v590_v16 = vpop.xlane.xlu0 %589  ;;  %v1289_v18 = vpop.eup %1288  ;;  %v652_v19 = vadd.f32 1.0, %v636_v12  ;;  %v1083_v20 = vadd.f32 -1.0, %v593_v15  ;;  %v653_v24 = vadd.f32 1.0, %v637_v9  ;;  %v680_v28 = vmul.f32 %v1287_v13, %v1508_v63 }
 0x211   : > { %v1082_v23 = vadd.f32 -1.0, %v590_v16  ;;  %v679_v25 = vmul.f32 %v1289_v18, %v1510_v0 }
 0x212   : > { %v639_v30 = vmax.f32 %v1083_v20, 0.0  ;;  %1296 = vrcp.f32 %v652_v19 }
 0x213   : > { %v638_v31 = vmax.f32 %v1082_v23, 0.0  ;;  %v599_v35 = vpop.xlane.xlu1 %598  ;;  %v695_v37 = vpack.c.bf16 %v680_v28, %v679_v25  ;;  %1298 = vrcp.f32 %v653_v24 }
 0x214   : > { %v596_v36 = vpop.xlane.xlu0 %595  ;;  %v1085_v39 = vadd.f32 -1.0, %v599_v35  ;;  %v655_v41 = vadd.f32 1.0, %v639_v30  ;;  %v1291_v63 = vpop.eup %1290 }
 0x215   : > { %v654_v38 = vadd.f32 1.0, %v638_v31  ;;  %v1084_v40 = vadd.f32 -1.0, %v596_v36  ;;  %1200 = vmatprep.mubr.msk.bf16.mxu1 %vm566_vm5, %v695_v37  ;;  %v682_v55 = vmul.f32 %v1291_v63, %v1516_v3 }
 0x216   : > { %v641_v42 = vmax.f32 %v1085_v39, 0.0 }
 0x217   : > { %v640_v43 = vmax.f32 %v1084_v40, 0.0  ;;  %1300 = vrcp.f32 %v654_v38  ;;  %v605_v0 = vpop.xlane.xlu1 %604 }
 0x218   : > { %v602_v44 = vpop.xlane.xlu0 %601  ;;  %v1087_v46 = vadd.f32 -1.0, %v605_v0  ;;  %v1293_v48 = vpop.eup %1292  ;;  %1302 = vrcp.f32 %v655_v41  ;;  %v657_v49 = vadd.f32 1.0, %v641_v42 }
 0x219   : > { %v656_v45 = vadd.f32 1.0, %v640_v43  ;;  %v1086_v47 = vadd.f32 -1.0, %v602_v44  ;;  %v681_v52 = vmul.f32 %v1293_v48, %v1518_v4  ;;  %v1295_v56 = vpop.eup %1294 }
 0x21a   : > { %v643_v50 = vmax.f32 %v1087_v46, 0.0  ;;  %v683_v9 = vmul.f32 %v1295_v56, %v1524_v7  ;;  %v829_v56 = vstv %s1099_s26 }
 0x21b   : > { %v642_v51 = vmax.f32 %v1086_v47, 0.0  ;;  %1304 = vrcp.f32 %v656_v45  ;;  %v611_v53 = vpop.xlane.xlu1 %610  ;;  %v696_v62 = vpack.c.bf16 %v682_v55, %v681_v52 }
 0x21c   : > { %v608_v54 = vpop.xlane.xlu0 %607  ;;  %v1089_v58 = vadd.f32 -1.0, %v611_v53  ;;  %v1297_v60 = vpop.eup %1296  ;;  %1306 = vrcp.f32 %v657_v49  ;;  %v659_v61 = vadd.f32 1.0, %v643_v50 }
 0x21d   : > { %v658_v57 = vadd.f32 1.0, %v642_v51  ;;  %v1088_v59 = vadd.f32 -1.0, %v608_v54  ;;  %v684_v5 = vmul.f32 %v1297_v60, %v1522_v6  ;;  %v1299_v8 = vpop.eup %1298  ;;  %1201 = vmatmul.mubr.msk.bf16.vlgmr.msra.gmra.mrb[0].mxu1 %vm566_vm5, %v696_v62 }
 0x21e   : > { %v645_v1 = vmax.f32 %v1089_v58, 0.0  ;;  %v685_v19 = vmul.f32 %v1299_v8, %v1532_v11 }
 0x21f   : > { %v644_v2 = vmax.f32 %v1088_v59, 0.0  ;;  %1308 = vrcp.f32 %v658_v57  ;;  %v697_v16 = vpack.c.bf16 %v684_v5, %v683_v9  ;;  %v835_v58 = vpop.permute.xlu1 %834 }
 0x220   : > { %v614_v4 = vpop.xlane.xlu0 %613  ;;  %v661_v3 = vadd.f32 1.0, %v645_v1  ;;  %1310 = vrcp.f32 %v659_v61  ;;  %v830_v1 = vadd.s32 %v829_v56, %v1458_v29 }
 0x221   : > { %v660_v12 = vadd.f32 1.0, %v644_v2  ;;  %v1090_v13 = vadd.f32 -1.0, %v614_v4  ;;  %v1301_v15 = vpop.eup %1300  ;;  %1204 = vmatprep.mubr.msk.bf16.mxu1 %vm566_vm5, %v697_v16  ;;  %v855_v4 = vld [vmem:[#allocation2] sm:$0xff]  ;;  %v1319_v16 = vld [vmem:[%s1664_s5 + $0x8] sm:$0xff] (!%p1104_p5)  }
 0x222   : > { %v686_v20 = vmul.f32 %v1301_v15, %v1530_v10  ;;  %v1303_v23 = vpop.eup %1302  ;;  %vm836_vm6 = vcmp.ge.s32.totalorder %v830_v1, %v835_v58  ;;  %v1364_v15 = vmov (!%p1104_p5), 0.0  }
 0x223   : > { %v646_v18 = vmax.f32 %v1090_v13, 0.0  ;;  %1312 = vrcp.f32 %v660_v12  ;;  %v687_v7 = vmul.f32 %v1303_v23, %v1546_v17  ;;  %v851_v5 = vpop.permute.xlu1 %850  ;;  %1236 = vmatprep.subr.bf16.mxu0 (!%p1104_p5), %v1364_v15  ;;  %1244 = vmatprep.mubr.msk.bf16.mxu0 (!%p1104_p5), %vm1365_vm10, %v1364_v15 }
 0x224   : > { %1314 = vrcp.f32 %v661_v3  ;;  %v698_v24 = vpack.c.bf16 %v686_v20, %v685_v19  ;;  %v1102_v8 = vpack.c.bf16 %v851_v5, %v851_v5  ;;  %v1321_v19 = vld [vmem:[%s1664_s5 + $0x18] sm:$0xff] (!%p1104_p5)  }
 0x225   : > { %v662_v6 = vadd.f32 1.0, %v646_v18  ;;  %v1305_v25 = vpop.eup %1304  ;;  %v1320_v18 = vld [vmem:[%s1664_s5 + $0x10] sm:$0xff] (!%p1104_p5)  }
 0x226   : > { %v688_v28 = vmul.f32 %v1305_v25, %v1538_v14  ;;  %v1307_v30 = vpop.eup %1306  ;;  %1205 = vmatmul.mubr.msk.bf16.gmra.mrb[4].mxu1 %vm566_vm5, %v698_v24 }
 0x227   : > { %1316 = vrcp.f32 %v662_v6  ;;  %v689_v10 = vmul.f32 %v1307_v30, %v1554_v22  ;;  %v839_v60 = vpop.permute.xlu0 %838 }
 0x228   : > { %v699_v31 = vpack.c.bf16 %v688_v28, %v687_v7  ;;  %vm840_vm2 = vcmp.lt.s32.totalorder %v830_v1, %v839_v60 }
 0x229   : > { %v1309_v11 = vpop.eup %1308  ;;  %vm841_vm7 = vmand %vm836_vm6, %vm840_vm2 }
 0x22a   : > { %1208 = vmatprep.mubr.msk.bf16.mxu1 %vm566_vm5, %v699_v31  ;;  %v690_v35 = vmul.f32 %v1309_v11, %v1552_v21  ;;  %v1311_v36 = vpop.eup %1310  ;;  %vm1101_vm8 = vmpackc.low %vm841_vm7, %vm841_vm7 }
 0x22b   : > { %v691_v40 = vmul.f32 %v1311_v36, %v1562_v27 }
 0x22c   : > { %v700_v37 = vpack.c.bf16 %v690_v35, %v689_v10 }
 0x22d   : > { %v1313_v38 = vpop.eup %1312 }
 0x22e   : > { %v1315_v39 = vpop.eup %1314  ;;  %v692_v17 = vmul.f32 %v1313_v38, %v1560_v26  ;;  %1209 = vmatmul.mubr.msk.bf16.gmra.mrb[8].mxu1 %vm566_vm5, %v700_v37 }
 0x22f   : > { %v693_v42 = vmul.f32 %v1315_v39, %v1570_v34 }
 0x230   : > { %v701_v41 = vpack.c.bf16 %v692_v17, %v691_v40 }
 0x231   : > { %v1317_v14 = vpop.eup %1316 }
 0x232   : > { %v694_v43 = vmul.f32 %v1317_v14, %v1568_v33  ;;  %1212 = vmatprep.mubr.msk.bf16.mxu1 %vm566_vm5, %v701_v41 }
 0x234   : > { %v702_v22 = vpack.c.bf16 %v694_v43, %v693_v42 }
 0x236   : > { %1213 = vmatmul.mubr.msk.bf16.gmra.mrb[12].mxu1 %vm566_vm5, %v702_v22 }
 0x237   : > { %1232 = vmatprep.mubr.msk.bf16.mxu1 %vm1363_vm1, %v1362_v32 }
 0x2f0   : > { %v1202_v21 = vpop.f32.mrb[0].mxu1 }
 0x2f1   : > { %v765_v27 = vpop.f32.mrb[1].mxu1 }
 0x2f2   : > { %v1203_v0 = vpop.f32.mrb[2].mxu1 }
 0x2f3   : > { %v857_v26 = vpack.c.bf16 %v1203_v0, %v1202_v21  ;;  %v768_v44 = vpop.f32.mrb[3].mxu1 }
 0x2f4   : > { %v856_v63 = vpack.c.bf16 %v768_v44, %v765_v27 }
 0x2f6   : > { %1217 = vmatpush3.bf16.msra.mxu1 %v856_v63 }
 0x2f7   : > { %1218 = vmatprep.subr.bf16.mxu1 %v1362_v32 }
 0x2f9   : > { %v1206_v34 = vpop.f32.mrb[4].mxu1 }
 0x2fa   : > { %v781_v45 = vpop.f32.mrb[5].mxu1  ;;  %1219 = vmatpush3.bf16.msra.mxu1 %v857_v26 }
 0x2fb   : > { %v1207_v33 = vpop.f32.mrb[6].mxu1  ;;  %1220 = vmatprep.subr.bf16.mxu1 %v1362_v32 }
 0x2fc   : > { %v859_v46 = vpack.c.bf16 %v1207_v33, %v1206_v34  ;;  %v784_v47 = vpop.f32.mrb[7].mxu1 }
 0x2fd   : > { %v858_v48 = vpack.c.bf16 %v784_v47, %v781_v45 }
 0x2ff   : > { %1221 = vmatpush3.bf16.msra.mxu1 %v858_v48 }
 0x300   : > { %1222 = vmatprep.subr.bf16.mxu1 %v1362_v32 }
 0x301   : > { %v1210_v49 = vpop.f32.mrb[8].mxu1 }
 0x302   : > { %v797_v50 = vpop.f32.mrb[9].mxu1 }
 0x303   : > { %v1211_v51 = vpop.f32.mrb[10].mxu1  ;;  %1223 = vmatpush3.bf16.msra.mxu1 %v859_v46 }
 0x304   : > { %v861_v52 = vpack.c.bf16 %v1211_v51, %v1210_v49  ;;  %v800_v53 = vpop.f32.mrb[11].mxu1  ;;  %1224 = vmatprep.subr.bf16.mxu1 %v1362_v32 }
 0x305   : > { %v860_v54 = vpack.c.bf16 %v800_v53, %v797_v50 }
 0x307   : > { %1225 = vmatpush3.bf16.msra.mxu1 %v860_v54 }
 0x308   : > { %1226 = vmatprep.subr.bf16.mxu1 %v1362_v32 }
 0x309   : > { %v1214_v55 = vpop.f32.mrb[12].mxu1 }
 0x30a   : > { %v813_v57 = vpop.f32.mrb[13].mxu1 }
 0x30b   : > { %v1215_v59 = vpop.f32.mrb[14].mxu1  ;;  %1227 = vmatpush3.bf16.msra.mxu1 %v861_v52 }
 0x30c   : > { %v863_v61 = vpack.c.bf16 %v1215_v59, %v1214_v55  ;;  %v816_v62 = vpop.f32.mrb[15].mxu1  ;;  %1228 = vmatprep.subr.bf16.mxu1 %v1362_v32 }
 0x30d   : > { %v862_v2 = vpack.c.bf16 %v816_v62, %v813_v57 }
 0x30f   : > { %1229 = vmatpush3.bf16.msra.mxu1 %v862_v2 }
 0x310   : > { %1230 = vmatprep.subr.bf16.mxu1 %v1362_v32  ;;  %v1318_v32 = vld [vmem:[%s1664_s5] sm:$0xff] (!%p1104_p5)  }
 0x311   : > { %1237 = vmatpush3.bf16.msra.mxu0 (!%p1104_p5), %v1318_v32 }
 0x312   : > { %1238 = vmatprep.subr.bf16.mxu0 (!%p1104_p5), %v1364_v15 }
 0x313   : > { %1231 = vmatpush3.bf16.msra.mxu1 %v863_v61 }
 0x315   : > { %1239 = vmatpush3.bf16.msra.mxu0 (!%p1104_p5), %v1319_v16 }
 0x316   : > { %1233 = vmatmul.mubr.msk.bf16.vlgmr.msra.gmra.mrb[16].mxu1 %vm1101_vm8, %v1102_v8  ;;  %1240 = vmatprep.subr.bf16.mxu0 (!%p1104_p5), %v1364_v15 }
 0x319   : > { %1241 = vmatpush3.bf16.msra.mxu0 (!%p1104_p5), %v1320_v18 }
 0x31a   : > { %1242 = vmatprep.subr.bf16.mxu0 (!%p1104_p5), %v1364_v15 }
 0x31d   : > { %1243 = vmatpush3.bf16.msra.mxu0 (!%p1104_p5), %v1321_v19 }
 0x3e6   : > { %910 = sbr.rel (%p1104_p5) target bundleno = 1229 (0x4cd), region = 52 }
 0x3e9   : > { %v898_v9 = vpop.f32.mrb[16].mxu1 }
 0x3ea   : > { %v904_v3 = vadd.f32 %v898_v9, %v855_v4  ;;  %v1234_v12 = vpop.f32.mrb[17].mxu1 }
 0x3eb   : > { %v901_v13 = vpop.f32.mrb[18].mxu1 }
 0x3ec   : > { %906 = vst.msk [vmem:[#allocation2] sm:$0xff] %vm905_vm9, %v904_v3  ;;  %v1235_v29 = vpop.f32.mrb[19].mxu1 }
 0x3f3   : > { %v911_v20 = vld [vmem:[#allocation2] sm:$0xff] }
 0x3f4   : > { %v912_v23 = vpack.c.bf16 %v911_v20, %v911_v20 }
 0x3f6   : > { %1245 = vmatmul.mubr.msk.bf16.vlgmr.msra.gmra.mrb[0].mxu0 %vm905_vm9, %v912_v23 }
 0x4c9   : > { %v982_v6 = vpop.f32.mrb[0].mxu0 }
 0x4ca   : > { %988 = vst [vmem:[#allocation3] sm:$0xff] %v982_v6  ;;  %v1246_v24 = vpop.f32.mrb[1].mxu0 }
 0x4cb   : > { %v985_v25 = vpop.f32.mrb[2].mxu0 }
 0x4cc   : > { %v1247_v7 = vpop.f32.mrb[3].mxu0 }
 0x4cd PF: > { %p1265_p6 = scmp.eq.s32.totalorder %s1408_s22, 1  ;;  %s1366_s11 = smov [#allocation3]  }
 0x4ce   : > { %s996_s12 = sshll.u32 %s1366_s11, 4  ;;  %s997_s12 = int_to_ptr.vmem [resolvable:$true] %s996_s12 }
 0x4cf   : > { %s1322_s13 = scalar_lea.vmem %s997_s12, 128  ;;  %p1329_p10 = scmp.lt.s32.totalorder %s997_s12, %s997_s12 }
 0x4d0   : > { %p1323_p7 = scmp.ne.s32.totalorder %s997_s12, %s1322_s13  ;;  %p1330_p11 = scmp.lt.s32.totalorder %s1322_s13, %s1322_s13 }
 0x4d2   : > { %p1324_p8 = pnand %p1323_p7, %p1265_p6  ;;  %p1331_p12 = por %p1330_p11, %p1329_p10 }
 0x4d4   : > { %p1325_p9 = pneg %p1324_p8 }
 0x4d6   : > { %p1332_p13 = pnand %p1331_p12, %p1325_p9 }
 0x4d8   : > { %1335 = shalt.err (!%p1332_p13)
}
 0x4d9   : > { %s1336_s16 = scalar_lea.hbm %s1665_s6, 128 }
 0x4da   : > { %p1337_p0 = scmp.ne.s32.totalorder %s1665_s6, %s1336_s16  ;;  %p1342_p3 = scmp.lt.u32.totalorder %s1336_s16, %s1665_s6 }
 0x4dc   : > { %p1338_p1 = pnand %p1337_p0, %p1265_p6 }
 0x4de   : > { %p1339_p2 = pneg %p1338_p1 }
 0x4e0   : > { %p1344_p4 = pnand %p1342_p3, %p1339_p2 }
 0x4e2   : > { %1347 = shalt.err (!%p1344_p4)
}
 0x4e3   : > { %1262 = dma.vmem_to_hbm [thread:$0]  (%p1265_p6), %s997_s12, 128, %s1665_s6, [#allocation4]  }
 0x4e4   : > { %1353 = dma.done.wait (%p1265_p6), [#allocation4], 128  }
 0x4e5   : > { %1355 = vsyncadd (%p1265_p6), [#allocation4], 4294967168 }
 0x4e6 PF: > { %s17_s21 = sadd.s32 1, %s1358_s21  }
 0x4e7   : > { %p14_p5 = scmp.ge.s32.totalorder %s17_s21, 4  }
 0x4e9   :  { %16 = sbr.rel (!%p14_p5) target bundleno = 1 (0x1), region = 79 }
 0x4f0   :  { %1009 = vsyncpa [#allocation4], 1 }
 0x4f1   :  { %1011 = vsyncpa [#allocation4 + $0x1], 1 }

</bundles_post_ra>
